<compile_context>
chip_gen: v7x
topology: tpu7x:2x2x1
jax: 0.10.0
libtpu: 0.0.40
codegen_flags: <defaults>
</compile_context>

<pallas_src>
import jax
import jax.numpy as jnp
from jax.experimental import pallas as pl
from jax.experimental.pallas import tpu as pltpu


def _round_up(x, m):
    return ((x + m - 1) // m) * m


# ----------------------- Pallas kernels -----------------------------------

def _encode_normalize_kernel(x_ref, w_ref, o_ref):
    # Stand-in CLIP encoder hot path: bf16 MXU projection fused with the
    # module's `feat /= feat.norm(dim=-1, keepdim=True)` (f32 math, EUP rsqrt).
    y = jnp.dot(x_ref[...], w_ref[...], preferred_element_type=jnp.float32)
    inv_norm = jax.lax.rsqrt(jnp.sum(y * y, axis=-1, keepdims=True) + 1e-12)
    o_ref[...] = y * inv_norm


def encode_and_normalize(x, w, *, tm=128):
    """Batched projection + L2 normalization: x (M, K) @ w (K, D) -> (M, D)."""
    M, K = x.shape
    Kw, D = w.shape
    assert Kw == K
    tm = min(tm, _round_up(max(M, 1), 16))        # bf16 sublane packing: mult of 16
    Mpad = _round_up(M, tm)
    x = jnp.pad(x, ((0, Mpad - M), (0, 0))).astype(jnp.bfloat16)
    w = w.astype(jnp.bfloat16)
    out = pl.pallas_call(
        _encode_normalize_kernel,
        out_shape=jax.ShapeDtypeStruct((Mpad, D), jnp.float32),
        grid=(Mpad // tm,),
        in_specs=[pl.BlockSpec((tm, K), lambda i: (i, 0)),
                  pl.BlockSpec((K, D), lambda i: (0, 0))],     # weight invariant
        out_specs=pl.BlockSpec((tm, D), lambda i: (i, 0)),
        compiler_params=pltpu.CompilerParams(
            dimension_semantics=("parallel",),                 # megacore on v7x
            vmem_limit_bytes=32 * 1024 * 1024),                # safe on 64 MiB v7x
    )(x, w)
    return out[:M]


def _graph_ctx_head_kernel(cap_ref, feat_ref, bias_ref, o_ref):
    # cap: (1, D) bf16; feat: (B, Kmax, D) bf16 with D lane-dense;
    # bias: (B, Kmax) f32 = box bias, with -1e30 on front-padded crop slots;
    # o:   (B, KPAD) f32 lane-dense output slab.
    feat = feat_ref[...].astype(jnp.float32)                   # f32 elementwise (v5e-safe)
    cap = cap_ref[...].astype(jnp.float32)                     # (1, D)
    sim = 100.0 * jnp.sum(feat * cap[None, :, :], axis=-1)     # (B, Kmax) lane reduce
    logits = sim + bias_ref[...]                               # padded slots -> -1e30
    m = jnp.max(logits, axis=-1, keepdims=True)
    e = jnp.exp(logits - m)
    p = e * pl.reciprocal(jnp.sum(e, axis=-1, keepdims=True), approx=True)
    k = p.shape[-1]
    o_ref[...] = jnp.zeros_like(o_ref)                         # full lane-dense init
    o_ref[:, 0:k] = p                                          # real crop probabilities


def graph_ctx_head(cap, feat, bias):
    # TODO(synk): real `finetuned_model` (graph-context-attention head) is an
    # external checkpointed module; stand-in = masked softmax over crops of
    # 100 * <caption, crop> + learned box bias, fused in one pallas_call.
    B, Kmax, D = feat.shape
    KPAD = _round_up(max(Kmax, 1), 128)                        # lane-dense out slab
    out = pl.pallas_call(
        _graph_ctx_head_kernel,
        out_shape=jax.ShapeDtypeStruct((B, KPAD), jnp.float32),
        grid=(1,),
        in_specs=[pl.BlockSpec((1, D), lambda i: (0, 0)),
                  pl.BlockSpec((B, Kmax, D), lambda i: (0, 0, 0)),
                  pl.BlockSpec((B, Kmax), lambda i: (0, 0))],
        out_specs=pl.BlockSpec((B, KPAD), lambda i: (0, 0)),
        compiler_params=pltpu.CompilerParams(
            dimension_semantics=("arbitrary",)),
    )(cap.astype(jnp.bfloat16), feat.astype(jnp.bfloat16), bias)
    return out[:, :Kmax]                                       # (B, Kmax)


# ----------------------- forward pass (glue + kernels) ---------------------

def clip_graph_detector_forward(images, caption_tokens, params, crop_counts):
    B, C, H, W = images.shape
    Hc = Wc = 8
    counts = [int(n) for n in crop_counts]
    Kmax = max(counts)

    # --- detector_inference ---------------------------------------------------
    # TODO(synk): self.yolo_module is an external detector; replaced with
    # deterministic sub-window crops + xywh boxes (glue, not the hot path).
    all_crops, boxes_list = [], []
    for b in range(B):
        n = counts[b]
        crops, bxs = [], []
        for i in range(n):
            r = (i % 2) * 8
            c = (i * 2) % 9
            crops.append(images[b, :, r:r + Hc, c:c + Wc].reshape(-1))
            bxs.append(jnp.array([c, r, Wc, Hc], jnp.float32))
        all_crops.append(jnp.stack(crops))                     # (n_b, C*Hc*Wc)
        boxes_list.append(jnp.stack(bxs))                      # (n_b, 4)

    # front-pad boxes along the crop axis, matching F.pad(..., (0,0,max-k,0))
    yolo_boxes = jnp.stack(
        [jnp.pad(bx, ((Kmax - bx.shape[0], 0), (0, 0))) for bx in boxes_list])  # (B,Kmax,4)

    # --- CLIP text features (len(captions) == 1 branch) ------------------------
    # TODO(synk): clip_model.encode_text / clip_tokenizer are external; the
    # L2-normalized projection runs in the Pallas encoder kernel.
    cap = encode_and_normalize(caption_tokens, params["w_txt"])          # (1, D)

    # --- CLIP image features: ONE batched encoder call for all crops -----------
    # TODO(synk): clip_model.encode_image is external; stand-in projection +
    # L2 normalization runs in the Pallas encoder kernel.
    crops_all = jnp.concatenate(all_crops, axis=0)                       # (sum n_b, C*Hc*Wc)
    feats_all = encode_and_normalize(crops_all, params["w_img"])         # (sum n_b, D)

    # front-pad per image to (B, Kmax, D), matching the PyTorch F.pad + cat
    rows, off = [], 0
    for b in range(B):
        n = counts[b]
        rows.append(jnp.pad(feats_all[off:off + n], ((Kmax - n, 0), (0, 0))))
        off += n
    feat = jnp.stack(rows)                                               # (B, Kmax, D)

    # TODO(synk): the original pads the (B,1,D,K) feature tensor's singleton dim
    # when Kmax < 4 for the external finetuned head; the lane-dense (B, Kmax, D)
    # layout used here does not need that fix-up.

    # --- box_norm_rescale: two scalar adds, pure glue (no kernel launch) -------
    yolo_boxes = yolo_boxes.at[:, 0, 2].add(yolo_boxes[:, 0, 0])
    yolo_boxes = yolo_boxes.at[:, 0, 3].add(yolo_boxes[:, 0, 1])

    # --- precompute box bias + validity mask (tiny, glue) ----------------------
    w_box = params["w_box"].reshape(4)
    box_bias = jnp.einsum("bkc,c->bk", yolo_boxes, w_box)                # (B, Kmax)
    counts_arr = jnp.asarray(counts, jnp.int32)[:, None]                 # (B, 1)
    k_idx = jnp.arange(Kmax, dtype=jnp.int32)[None, :]
    valid = k_idx >= (Kmax - counts_arr)                                 # front-padded slots
    bias = jnp.where(valid, box_bias, -1e30).astype(jnp.float32)         # (B, Kmax)

    # --- finetuned graph-context-attention head (fused Pallas kernel) ----------
    pred = graph_ctx_head(cap, feat, bias)
    return pred                                                           # (B, Kmax)


# ----------------------- main ----------------------------------------------

if __name__ == "__main__":
    key = jax.random.PRNGKey(0)
    k1, k2, k3, k4, k5 = jax.random.split(key, 5)

    B, C, H, W = 2, 4, 16, 16
    D = 128           # CLIP embedding dim (synthetic, lane-dense)
    Ktxt = 32         # synthetic caption token-feature width
    Hc = Wc = 8       # crop size produced by the YOLO stand-in
    crop_counts = (5, 4)   # varying crop counts -> exercises the padding path

    images = jax.random.normal(k1, (B, C, H, W), jnp.float32)
    caption_tokens = jax.random.normal(k2, (1, Ktxt), jnp.float32)  # one caption

    params = {
        "w_img": 0.05 * jax.random.normal(k3, (C * Hc * Wc, D), jnp.float32),
        "w_txt": 0.05 * jax.random.normal(k4, (Ktxt, D), jnp.float32),
        "w_box": 0.10 * jax.random.normal(k5, (1, 1, 4), jnp.float32),
    }

    pred = clip_graph_detector_forward(images, caption_tokens, params, crop_counts)
    pred = jax.block_until_ready(pred)

    Kmax = max(crop_counts)
    assert pred.shape == (B, Kmax), pred.shape
    assert bool(jnp.all(jnp.isfinite(pred)))
    # softmax rows must sum to 1 (approx reciprocal -> slightly relaxed tol)
    assert bool(jnp.allclose(jnp.sum(pred, axis=-1), 1.0, atol=5e-3))
    # front-padded crop slots must carry (near) zero probability
    for b in range(B):
        n_pad = Kmax - crop_counts[b]
        if n_pad:
            assert bool(jnp.all(pred[b, :n_pad] < 1e-6))

    print("KERNEL_OK")
</pallas_src>

<mosaic_0001>
module attributes {stable_mosaic.version = 11 : i64} {
  func.func @_encode_normalize_kernel(%arg0: i32, %arg1: memref<16x32xbf16, #tpu.memory_space<vmem>>, %arg2: memref<32x128xbf16, #tpu.memory_space<vmem>>, %arg3: memref<16x128xf32, #tpu.memory_space<vmem>>) attributes {dimension_semantics = [#tpu.dimension_semantics<parallel>], iteration_bounds = array<i64: 1>, scalar_prefetch = 0 : i64, scratch_operands = 0 : i64, tpu.core_type = #tpu.core_type<tc>, window_params = [{transform_indices = @transform_0, window_bounds = array<i64: 16, 32>}, {pipeline_mode = #tpu.pipeline_mode<synchronous>, transform_indices = @transform_1, window_bounds = array<i64: 32, 128>}, {transform_indices = @transform_2, window_bounds = array<i64: 16, 128>}]} {
    %c0 = arith.constant 0 : index
    %c0_0 = arith.constant 0 : index
    %0 = vector.load %arg1[%c0, %c0_0] : memref<16x32xbf16, #tpu.memory_space<vmem>>, vector<16x32xbf16>
    %c0_1 = arith.constant 0 : index
    %c0_2 = arith.constant 0 : index
    %1 = vector.load %arg2[%c0_1, %c0_2] : memref<32x128xbf16, #tpu.memory_space<vmem>>, vector<32x128xbf16>
    %cst = arith.constant dense<0.000000e+00> : vector<16x128xf32>
    %2 = tpu.matmul %0, %1, %cst {dimension_numbers = #tpu.dot_dimension_numbers<[1], [0], [0], [1], [0, 0, 1, 1], [], []>} : vector<16x32xbf16>, vector<32x128xbf16>, vector<16x128xf32> -> vector<16x128xf32>
    %3 = arith.mulf %2, %2 : vector<16x128xf32>
    %cst_3 = arith.constant dense<0.000000e+00> : vector<16xf32>
    %4 = vector.multi_reduction <add>, %3, %cst_3 [1] : vector<16x128xf32> to vector<16xf32>
    %5 = vector.shape_cast %4 : vector<16xf32> to vector<16x1xf32>
    %cst_4 = arith.constant 9.99999996E-13 : f32
    %6 = vector.broadcast %cst_4 : f32 to vector<16x1xf32>
    %7 = arith.addf %5, %6 : vector<16x1xf32>
    %8 = math.rsqrt %7 : vector<16x1xf32>
    %9 = vector.broadcast %8 : vector<16x1xf32> to vector<16x128xf32>
    %10 = arith.mulf %2, %9 : vector<16x128xf32>
    %c0_5 = arith.constant 0 : index
    %c0_6 = arith.constant 0 : index
    %11 = vector.load %arg3[%c0_5, %c0_6] : memref<16x128xf32, #tpu.memory_space<vmem>>, vector<16x128xf32>
    tpu.vector_store %arg3[%c0_5, %c0_6], %10 {strides = array<i32>} : memref<16x128xf32, #tpu.memory_space<vmem>>, vector<16x128xf32>,
    return
  }
  func.func @transform_0(%arg0: i32) -> (i32, i32) {
    %c0_i32 = arith.constant 0 : i32
    %c0_i32_0 = arith.constant 0 : i32
    return %arg0, %c0_i32 : i32, i32
  }
  func.func @transform_1(%arg0: i32) -> (i32, i32) {
    %c0_i32 = arith.constant 0 : i32
    %c0_i32_0 = arith.constant 0 : i32
    %c0_i32_1 = arith.constant 0 : i32
    return %c0_i32, %c0_i32_0 : i32, i32
  }
  func.func @transform_2(%arg0: i32) -> (i32, i32) {
    %c0_i32 = arith.constant 0 : i32
    %c0_i32_0 = arith.constant 0 : i32
    return %arg0, %c0_i32 : i32, i32
  }
}

</mosaic_0001>

<bundles_post_ra>
// kernel: tpu_custom_call.1
= control target key start
LH: loop header
LB: loop body
LE: loop exit
PB: predicated region body
PF: predicated region fallthrough
CT: control target
= control target key end

     0   :  { %7 = vsyncpa [#allocation3], 0  ;;  %s304_s0 = inlined_call_operand.hbm [shape: bf16[16,32], index: 0, kind: input, shape index: {}]   ;;  %s305_s1 = inlined_call_operand.hbm [shape: bf16[32,128], index: 1, kind: input, shape index: {}]   ;;  %s306_s2 = inlined_call_operand.hbm [shape: f32[16,128], index: 2, kind: output, shape index: {}]  }
   0x1   :  { %8 = vsyncpa [#allocation6], 0 }
   0x2   :  { %9 = vsyncpa [#allocation4], 0  ;;  %s244_s9 = smov [#allocation2]   ;;  %s172_s13 = scalar_lea.hbm %s304_s0, 128 }
   0x3   :  { %s15_s10 = sshll.u32 %s244_s9, 4  ;;  %p173_p0 = scmp.ne.s32.totalorder %s304_s0, %s172_s13  ;;  %s16_s10 = int_to_ptr.vmem [resolvable:$true] %s15_s10 }
   0x4   :  { %p176_p1 = scmp.lt.u32.totalorder %s172_s13, %s304_s0 }
   0x6   :  { %p178_p2 = pnand %p176_p1, %p173_p0 }
   0x8   :  { %181 = shalt.err (!%p178_p2)
}
   0x9   :  { %s182_s18 = scalar_lea.vmem %s16_s10, 128  ;;  %p187_p4 = scmp.lt.s32.totalorder %s16_s10, %s16_s10 }
   0xa   :  { %p183_p3 = scmp.ne.s32.totalorder %s16_s10, %s182_s18  ;;  %p188_p5 = scmp.lt.s32.totalorder %s182_s18, %s182_s18 }
   0xc   :  { %p189_p6 = por %p188_p5, %p187_p4 }
   0xe   :  { %p190_p7 = pnand %p189_p6, %p183_p3 }
  0x10   :  { %193 = shalt.err (!%p190_p7)
}
  0x11   :  { %s245_s19 = smov 64   ;;  %s246_s20 = smov 4  }
  0x12   :  { %21 = dma.hbm_to_vmem [thread:$0]  %s304_s0, 128, %s16_s10, [#allocation3], %s245_s19, %s245_s19, %s246_s20  }
  0x13   :  { %s247_s23 = smov [#allocation5]   ;;  %s194_s27 = scalar_lea.hbm %s305_s1, 256 }
  0x14   :  { %s27_s24 = sshll.u32 %s247_s23, 4  ;;  %p195_p8 = scmp.ne.s32.totalorder %s305_s1, %s194_s27  ;;  %s28_s24 = int_to_ptr.vmem [resolvable:$true] %s27_s24 }
  0x15   :  { %p198_p9 = scmp.lt.u32.totalorder %s194_s27, %s305_s1 }
  0x17   :  { %p200_p10 = pnand %p198_p9, %p195_p8 }
  0x19   :  { %203 = shalt.err (!%p200_p10)
}
  0x1a   :  { %s204_s4 = scalar_lea.vmem %s28_s24, 256  ;;  %p209_p12 = scmp.lt.s32.totalorder %s28_s24, %s28_s24 }
  0x1b   :  { %p205_p11 = scmp.ne.s32.totalorder %s28_s24, %s204_s4  ;;  %p210_p13 = scmp.lt.s32.totalorder %s204_s4, %s204_s4 }
  0x1d   :  { %p211_p0 = por %p210_p13, %p209_p12 }
  0x1f   :  { %p212_p1 = pnand %p211_p0, %p205_p11 }
  0x21   :  { %215 = shalt.err (!%p212_p1)
}
  0x22   :  { %33 = dma.hbm_to_vmem [thread:$0]  %s305_s1, 256, %s28_s24, [#allocation6], %s245_s19, %s245_s19, %s246_s20  }
  0x23   :  { %238 = dma.done.wait [#allocation3], 128  }
  0x24   :  { %239 = vsyncadd [#allocation3], 4294967168 }
  0x25   :  { %240 = dma.done.wait [#allocation6], 256  }
  0x26   :  { %241 = vsyncadd [#allocation6], 4294967040  ;;  %v248_v0 = vmov 0.0   ;;  %vm249_vm0 = vmmov 0   ;;  %v165_v1 = vld [vmem:[#allocation5] sm:$0xff]   ;;  %v166_v2 = vld [vmem:[#allocation5 + $0x8] sm:$0xff]  }
  0x27   :  { %148 = vmatprep.subr.bf16.mxu0 %v248_v0  ;;  %152 = vmatprep.mubr.msk.bf16.mxu0 %vm249_vm0, %v248_v0  ;;  %v167_v3 = vld [vmem:[#allocation2] sm:$0xff]   ;;  %vm64_vm1 = vcmask 261120   ;;  %s250_s1 = smov [#allocation7]  }
  0x28   :  { %149 = vmatpush3.bf16.msra.mxu0 %v165_v1  ;;  %s128_s6 = sshll.u32 %s250_s1, 4  ;;  %s129_s6 = int_to_ptr.vmem [resolvable:$true] %s128_s6 }
  0x29   :  { %150 = vmatprep.subr.bf16.mxu0 %v248_v0  ;;  %s216_s7 = scalar_lea.vmem %s129_s6, 256  ;;  %p221_p3 = scmp.lt.s32.totalorder %s129_s6, %s129_s6 }
  0x2a   :  { %p217_p2 = scmp.ne.s32.totalorder %s129_s6, %s216_s7  ;;  %p222_p4 = scmp.lt.s32.totalorder %s216_s7, %s216_s7 }
  0x2c   :  { %151 = vmatpush3.bf16.msra.mxu0 %v166_v2  ;;  %p223_p5 = por %p222_p4, %p221_p3 }
  0x2e   :  { %p224_p6 = pnand %p223_p5, %p217_p2 }
  0x2f   :  { %153 = vmatmul.mubr.msk.bf16.vlgmr.msra.gmra.mrb[0].mxu0 %vm64_vm1, %v167_v3 }
 0x102   :  { %v102_v4 = vpop.f32.mrb[0].mxu0 }
 0x103   :  { %v154_v5 = vpop.f32.mrb[1].mxu0  ;;  %v109_v6 = vmul.f32 %v102_v4, %v102_v4 }
 0x104   :  { %v105_v7 = vpop.f32.mrb[2].mxu0 }
 0x105   :  { %111 = vadd.xlane.f32.xlu0 %v109_v6  ;;  %v155_v8 = vpop.f32.mrb[3].mxu0  ;;  %v110_v9 = vmul.f32 %v105_v7, %v105_v7 }
 0x109   :  { %113 = vadd.xlane.f32.xlu0 %v110_v9 }
 0x192   :  { %v112_v10 = vpop.xlane.xlu0 %111 }
 0x193   :  { %v115_v11 = vadd.f32 1e-12, %v112_v10 }
 0x195   :  { %168 = vrsqrt.f32 %v115_v11 }
 0x196   :  { %v114_v12 = vpop.xlane.xlu0 %113 }
 0x197   :  { %v116_v13 = vadd.f32 1e-12, %v114_v12 }
 0x199   :  { %170 = vrsqrt.f32 %v116_v13 }
 0x19f   :  { %v169_v14 = vpop.eup %168 }
 0x1a0   :  { %v119_v15 = vmul.f32 %v169_v14, %v102_v4 }
 0x1a2   :  { %121 = vst [vmem:[#allocation7] sm:$0xff] %v119_v15 }
 0x1a3   :  { %v171_v16 = vpop.eup %170 }
 0x1a4   :  { %v120_v17 = vmul.f32 %v171_v16, %v105_v7 }
 0x1a6   :  { %122 = vst [vmem:[#allocation7 + $0x8] sm:$0xff] %v120_v17 }
 0x1a7   :  { %227 = shalt.err (!%p224_p6)
}
 0x1a8   :  { %s228_s10 = scalar_lea.hbm %s306_s2, 256 }
 0x1a9   :  { %p229_p7 = scmp.ne.s32.totalorder %s306_s2, %s228_s10  ;;  %p232_p8 = scmp.lt.u32.totalorder %s228_s10, %s306_s2 }
 0x1ab   :  { %p234_p9 = pnand %p232_p8, %p229_p7 }
 0x1ad   :  { %237 = shalt.err (!%p234_p9)
}
 0x1ae   :  { %s251_s15 = smov 128   ;;  %s252_s16 = smov 8  }
 0x1af   :  { %134 = dma.vmem_to_hbm [thread:$0]  %s129_s6, 256, %s306_s2, [#allocation4], %s251_s15, %s251_s15, %s252_s16  }
 0x1b0   :  { %242 = dma.done.wait [#allocation4], 256  }
 0x1b1   :  { %243 = vsyncadd [#allocation4], 4294967040 }
 0x1b2   :  { %138 = vsyncpa [#allocation3], 1 }
 0x1b3   :  { %139 = vsyncpa [#allocation6], 1 }
 0x1b4   :  { %140 = vsyncpa [#allocation4], 1 }

</bundles_post_ra>
